<compile_context>
chip_gen: v6e
topology: v6e:2x2x1
jax: 0.10.0
libtpu: 0.0.40
codegen_flags: <defaults>
</compile_context>

<pallas_src>
import jax
import jax.numpy as jnp
from jax import lax
from jax.experimental import pallas as pl
from jax.experimental.pallas import tpu as pltpu

EPS = 1e-5


def expander_kernel(x_ref, w_ref, b_ref, gamma_ref, beta_ref, o_ref, act_ref):
    # x_ref:   (Bt, R, C)           VMEM
    # w/b/gamma/beta: (P,)          SMEM scalars
    # o_ref:   (Bt, half, R, C)     VMEM  (one GroupNorm group per grid step)
    # act_ref: (half, R, C) f32     VMEM scratch (staged activations)
    Bt, R, C = x_ref.shape
    half = o_ref.shape[1]
    grp = pl.program_id(1)                     # which GroupNorm group
    p0 = grp * half                            # first global channel of group
    inv_count = jnp.float32(1.0 / (half * R * C))

    def per_batch(bi, carry):
        xb = x_ref[bi].astype(jnp.float32)     # (R, C)

        # ---- Pass 1: stage relu(x*w+b), accumulate vector stats. -----------
        def pass1(pp, acc):
            s_vec, s2_vec = acc
            p = p0 + pp
            r = jnp.maximum(xb * w_ref[p] + b_ref[p], 0.0)
            act_ref[pp] = r
            return (s_vec + r, s2_vec + r * r)

        zero = jnp.zeros((R, C), jnp.float32)
        s_vec, s2_vec = lax.fori_loop(0, half, pass1, (zero, zero), unroll=2)

        # Single cross-lane reduce per group (XLU) instead of per-channel.
        mean = jnp.sum(s_vec) * inv_count
        ex2 = jnp.sum(s2_vec) * inv_count
        var = jnp.maximum(ex2 - mean * mean, 0.0)
        inv = lax.rsqrt(var + EPS)

        # ---- Pass 2: load staged r, folded affine, add x, store. -----------
        def pass2(pp, c):
            p = p0 + pp
            g = gamma_ref[p]
            scale = g * inv                            # scalar
            shift = beta_ref[p] - g * mean * inv       # scalar
            r = act_ref[pp]
            o_ref[bi, pp] = (xb + r * scale + shift).astype(o_ref.dtype)
            return c

        lax.fori_loop(0, half, pass2, 0, unroll=2)
        return carry

    lax.fori_loop(0, Bt, per_batch, 0)


def _pick_batch_tile(B, per_batch_out, per_batch_in, fixed_bytes,
                     target_block_bytes=4 << 20, vmem_budget_bytes=40 << 20):
    """Largest divisor of B whose double-buffered blocks + scratch fit VMEM and
    whose output block stays near the ~4 MiB sweet spot."""
    best = 1
    for d in range(1, B + 1):
        if B % d:
            continue
        out_block = d * per_batch_out
        total = 2 * d * (per_batch_out + per_batch_in) + fixed_bytes
        if out_block <= target_block_bytes and total <= vmem_budget_bytes:
            best = d
    return best


def expander(x, w, b, gamma, beta):
    B, N, D = x.shape
    P = w.shape[0]
    assert P % 2 == 0, "GroupNorm(2, P) requires P divisible by 2"
    half = P // 2
    out_dtype = x.dtype

    # Lane-dense spatial layout: fold (N, D) into (R, 128) when possible so
    # each per-channel store is an unmasked full-lane vst.
    S = N * D
    if S % 128 == 0:
        R, C = S // 128, 128
    else:
        R, C = N, D
    x2 = x.reshape(B, R, C)

    out_itemsize = jnp.dtype(out_dtype).itemsize
    in_itemsize = jnp.dtype(x.dtype).itemsize
    per_batch_out = half * R * C * out_itemsize          # one group's channels
    per_batch_in = R * C * in_itemsize
    scratch_bytes = half * R * C * 4                     # f32 staging scratch

    Bt = _pick_batch_tile(B, per_batch_out, per_batch_in, scratch_bytes)
    grid = (B // Bt, 2)                                  # (batch tiles, groups)

    needed = 2 * Bt * (per_batch_out + per_batch_in) + scratch_bytes
    vmem_limit = int(min(max(2 * needed + (2 << 20), 16 << 20), 40 << 20))

    out = pl.pallas_call(
        expander_kernel,
        out_shape=jax.ShapeDtypeStruct((B, P, R, C), out_dtype),
        grid_spec=pltpu.PrefetchScalarGridSpec(
            num_scalar_prefetch=0,
            grid=grid,
            in_specs=[
                pl.BlockSpec((Bt, R, C), lambda i, g: (i, 0, 0)),
                pl.BlockSpec(memory_space=pltpu.MemorySpace.SMEM),
                pl.BlockSpec(memory_space=pltpu.MemorySpace.SMEM),
                pl.BlockSpec(memory_space=pltpu.MemorySpace.SMEM),
                pl.BlockSpec(memory_space=pltpu.MemorySpace.SMEM),
            ],
            out_specs=pl.BlockSpec((Bt, half, R, C), lambda i, g: (i, g, 0, 0)),
            scratch_shapes=[pltpu.VMEM((half, R, C), jnp.float32)],
        ),
        compiler_params=pltpu.CompilerParams(
            dimension_semantics=("parallel", "parallel"),
            vmem_limit_bytes=vmem_limit,
        ),
    )(x2, w, b, gamma, beta)

    return out.reshape(B, P, N, D)


def expander_ref(x, w, b, gamma, beta):
    # Pure-JAX reference mirroring the PyTorch module.
    res = jax.nn.relu(x[..., None] * w[None, None, None, :] + b)   # (B, N, D, P)
    res = jnp.transpose(res, (0, 3, 1, 2))                         # (B, P, N, D)
    B, P, N, D = res.shape
    g = res.reshape(B, 2, P // 2, N, D)
    mean = g.mean(axis=(2, 3, 4), keepdims=True)
    var = ((g - mean) ** 2).mean(axis=(2, 3, 4), keepdims=True)
    gn = (g - mean) / jnp.sqrt(var + EPS)
    gn = gn.reshape(B, P, N, D)
    gn = gn * gamma[None, :, None, None] + beta[None, :, None, None]
    return x[:, None, :, :] + gn


if __name__ == "__main__":
    B, N, D, P = 4, 8, 128, 4   # P must be divisible by 2 groups

    key = jax.random.PRNGKey(0)
    kx, kw, kb, kg, kbeta = jax.random.split(key, 5)

    x = jax.random.normal(kx, (B, N, D), dtype=jnp.float32)
    # nn.Linear(1, P): weight (P, 1) ~ U(-1, 1), bias (P,) ~ U(-1, 1)
    w = jax.random.uniform(kw, (P,), jnp.float32, minval=-1.0, maxval=1.0)
    b = jax.random.uniform(kb, (P,), jnp.float32, minval=-1.0, maxval=1.0)
    # GroupNorm affine params (defaults ones/zeros); randomized to exercise
    # the affine path while staying deterministic.
    gamma = 1.0 + 0.1 * jax.random.normal(kg, (P,), jnp.float32)
    beta = 0.1 * jax.random.normal(kbeta, (P,), jnp.float32)

    out = expander(x, w, b, gamma, beta)
    out = jax.block_until_ready(out)

    ref = expander_ref(x, w, b, gamma, beta)
    assert out.shape == (B, P, N, D)
    assert jnp.allclose(out, ref, atol=1e-4, rtol=1e-4), (
        f"max abs err = {jnp.max(jnp.abs(out - ref))}"
    )
    print("KERNEL_OK")
</pallas_src>

<mosaic_0001>
module attributes {stable_mosaic.version = 11 : i64} {
  func.func @expander_kernel(%arg0: i32, %arg1: i32, %arg2: memref<4x8x128xf32, #tpu.memory_space<vmem>>, %arg3: memref<4xf32, #tpu.memory_space<smem>>, %arg4: memref<4xf32, #tpu.memory_space<smem>>, %arg5: memref<4xf32, #tpu.memory_space<smem>>, %arg6: memref<4xf32, #tpu.memory_space<smem>>, %arg7: memref<4x2x8x128xf32, #tpu.memory_space<vmem>>, %arg8: memref<2x8x128xf32, #tpu.memory_space<vmem>>) attributes {dimension_semantics = [#tpu.dimension_semantics<parallel>, #tpu.dimension_semantics<parallel>], iteration_bounds = array<i64: 1, 2>, scalar_prefetch = 0 : i64, scratch_operands = 1 : i64, tpu.core_type = #tpu.core_type<tc>, window_params = [{transform_indices = @transform_0, window_bounds = array<i64: 4, 8, 128>}, {transform_indices = @transform_1, window_bounds = array<i64: 4>}, {transform_indices = @transform_2, window_bounds = array<i64: 4>}, {transform_indices = @transform_3, window_bounds = array<i64: 4>}, {transform_indices = @transform_4, window_bounds = array<i64: 4>}, {transform_indices = @transform_5, window_bounds = array<i64: 4, 2, 8, 128>}]} {
    %c2_i32 = arith.constant 2 : i32
    %0 = arith.muli %arg1, %c2_i32 : i32
    %cst = arith.constant 4.8828125E-4 : f32
    %c0_i32 = arith.constant 0 : i32
    %c4_i32 = arith.constant 4 : i32
    %1 = arith.addi %c0_i32, %c4_i32 : i32
    %c1_i32 = arith.constant 1 : i32
    scf.for %arg9 = %c0_i32 to %1 step %c1_i32  : i32 {
      %2 = arith.index_cast %arg9 : i32 to index
      %c0 = arith.constant 0 : index
      %c0_1 = arith.constant 0 : index
      %3 = vector.load %arg2[%2, %c0, %c0_1] : memref<4x8x128xf32, #tpu.memory_space<vmem>>, vector<1x8x128xf32>
      %4 = vector.shape_cast %3 : vector<1x8x128xf32> to vector<8x128xf32>
      %cst_2 = arith.constant 0.000000e+00 : f32
      %5 = vector.broadcast %cst_2 : f32 to vector<8x128xf32>
      %c0_i32_3 = arith.constant 0 : i32
      %6 = arith.addi %0, %c0_i32_3 : i32
      %7 = arith.index_cast %6 : i32 to index
      %8 = memref.load %arg3[%7] : memref<4xf32, #tpu.memory_space<smem>>
      %9 = vector.broadcast %8 : f32 to vector<8x128xf32>
      %10 = arith.mulf %4, %9 : vector<8x128xf32>
      %11 = arith.index_cast %6 : i32 to index
      %12 = memref.load %arg4[%11] : memref<4xf32, #tpu.memory_space<smem>>
      %13 = vector.broadcast %12 : f32 to vector<8x128xf32>
      %14 = arith.addf %10, %13 : vector<8x128xf32>
      %cst_4 = arith.constant 0.000000e+00 : f32
      %15 = vector.broadcast %cst_4 : f32 to vector<8x128xf32>
      %16 = arith.maximumf %14, %15 : vector<8x128xf32>
      %17 = arith.index_cast %c0_i32_3 : i32 to index
      %c0_5 = arith.constant 0 : index
      %c0_6 = arith.constant 0 : index
      %18 = vector.load %arg8[%17, %c0_5, %c0_6] : memref<2x8x128xf32, #tpu.memory_space<vmem>>, vector<1x8x128xf32>
      %19 = vector.shape_cast %18 : vector<1x8x128xf32> to vector<8x128xf32>
      %20 = vector.shape_cast %16 : vector<8x128xf32> to vector<1x8x128xf32>
      tpu.vector_store %arg8[%17, %c0_5, %c0_6], %20 {strides = array<i32>} : memref<2x8x128xf32, #tpu.memory_space<vmem>>, vector<1x8x128xf32>,
      %21 = arith.addf %5, %16 : vector<8x128xf32>
      %22 = arith.mulf %16, %16 : vector<8x128xf32>
      %23 = arith.addf %5, %22 : vector<8x128xf32>
      %c1_i32_7 = arith.constant 1 : i32
      %24 = arith.addi %0, %c1_i32_7 : i32
      %25 = arith.index_cast %24 : i32 to index
      %26 = memref.load %arg3[%25] : memref<4xf32, #tpu.memory_space<smem>>
      %27 = vector.broadcast %26 : f32 to vector<8x128xf32>
      %28 = arith.mulf %4, %27 : vector<8x128xf32>
      %29 = arith.index_cast %24 : i32 to index
      %30 = memref.load %arg4[%29] : memref<4xf32, #tpu.memory_space<smem>>
      %31 = vector.broadcast %30 : f32 to vector<8x128xf32>
      %32 = arith.addf %28, %31 : vector<8x128xf32>
      %cst_8 = arith.constant 0.000000e+00 : f32
      %33 = vector.broadcast %cst_8 : f32 to vector<8x128xf32>
      %34 = arith.maximumf %32, %33 : vector<8x128xf32>
      %35 = arith.index_cast %c1_i32_7 : i32 to index
      %c0_9 = arith.constant 0 : index
      %c0_10 = arith.constant 0 : index
      %36 = vector.load %arg8[%35, %c0_9, %c0_10] : memref<2x8x128xf32, #tpu.memory_space<vmem>>, vector<1x8x128xf32>
      %37 = vector.shape_cast %36 : vector<1x8x128xf32> to vector<8x128xf32>
      %38 = vector.shape_cast %34 : vector<8x128xf32> to vector<1x8x128xf32>
      tpu.vector_store %arg8[%35, %c0_9, %c0_10], %38 {strides = array<i32>} : memref<2x8x128xf32, #tpu.memory_space<vmem>>, vector<1x8x128xf32>,
      %39 = arith.addf %21, %34 : vector<8x128xf32>
      %40 = arith.mulf %34, %34 : vector<8x128xf32>
      %41 = arith.addf %23, %40 : vector<8x128xf32>
      %c2_i32_11 = arith.constant 2 : i32
      %42 = vector.shape_cast %39 : vector<8x128xf32> to vector<1x8x128xf32>
      %cst_12 = arith.constant dense<0.000000e+00> : vector<1xf32>
      %43 = vector.multi_reduction <add>, %42, %cst_12 [1, 2] : vector<1x8x128xf32> to vector<1xf32>
      %44 = vector.shape_cast %43 : vector<1xf32> to vector<1x1x1xf32>
      %45 = vector.extract %44[0, 0, 0] : f32 from vector<1x1x1xf32>
      %46 = arith.mulf %45, %cst : f32
      %47 = vector.shape_cast %41 : vector<8x128xf32> to vector<1x8x128xf32>
      %cst_13 = arith.constant dense<0.000000e+00> : vector<1xf32>
      %48 = vector.multi_reduction <add>, %47, %cst_13 [1, 2] : vector<1x8x128xf32> to vector<1xf32>
      %49 = vector.shape_cast %48 : vector<1xf32> to vector<1x1x1xf32>
      %50 = vector.extract %49[0, 0, 0] : f32 from vector<1x1x1xf32>
      %51 = arith.mulf %50, %cst : f32
      %52 = arith.mulf %46, %46 : f32
      %53 = arith.subf %51, %52 : f32
      %cst_14 = arith.constant 0.000000e+00 : f32
      %54 = arith.maximumf %53, %cst_14 : f32
      %cst_15 = arith.constant 9.99999974E-6 : f32
      %55 = arith.addf %54, %cst_15 : f32
      %56 = math.rsqrt %55 : f32
      %c0_i32_16 = arith.constant 0 : i32
      %57 = arith.addi %0, %c0_i32_16 : i32
      %58 = arith.index_cast %57 : i32 to index
      %59 = memref.load %arg5[%58] : memref<4xf32, #tpu.memory_space<smem>>
      %60 = arith.mulf %59, %56 : f32
      %61 = arith.index_cast %57 : i32 to index
      %62 = memref.load %arg6[%61] : memref<4xf32, #tpu.memory_space<smem>>
      %63 = arith.mulf %59, %46 : f32
      %64 = arith.mulf %63, %56 : f32
      %65 = arith.subf %62, %64 : f32
      %66 = arith.index_cast %c0_i32_16 : i32 to index
      %c0_17 = arith.constant 0 : index
      %c0_18 = arith.constant 0 : index
      %67 = vector.load %arg8[%66, %c0_17, %c0_18] : memref<2x8x128xf32, #tpu.memory_space<vmem>>, vector<1x8x128xf32>
      %68 = vector.shape_cast %67 : vector<1x8x128xf32> to vector<8x128xf32>
      %69 = vector.broadcast %60 : f32 to vector<8x128xf32>
      %70 = arith.mulf %68, %69 : vector<8x128xf32>
      %71 = arith.addf %4, %70 : vector<8x128xf32>
      %72 = vector.broadcast %65 : f32 to vector<8x128xf32>
      %73 = arith.addf %71, %72 : vector<8x128xf32>
      %74 = arith.index_cast %arg9 : i32 to index
      %75 = arith.index_cast %c0_i32_16 : i32 to index
      %c0_19 = arith.constant 0 : index
      %c0_20 = arith.constant 0 : index
      %76 = vector.load %arg7[%74, %75, %c0_19, %c0_20] : memref<4x2x8x128xf32, #tpu.memory_space<vmem>>, vector<1x1x8x128xf32>
      %77 = vector.shape_cast %76 : vector<1x1x8x128xf32> to vector<8x128xf32>
      %78 = vector.shape_cast %73 : vector<8x128xf32> to vector<1x1x8x128xf32>
      tpu.vector_store %arg7[%74, %75, %c0_19, %c0_20], %78 {strides = array<i32>} : memref<4x2x8x128xf32, #tpu.memory_space<vmem>>, vector<1x1x8x128xf32>,
      %c1_i32_21 = arith.constant 1 : i32
      %79 = arith.addi %0, %c1_i32_21 : i32
      %80 = arith.index_cast %79 : i32 to index
      %81 = memref.load %arg5[%80] : memref<4xf32, #tpu.memory_space<smem>>
      %82 = arith.mulf %81, %56 : f32
      %83 = arith.index_cast %79 : i32 to index
      %84 = memref.load %arg6[%83] : memref<4xf32, #tpu.memory_space<smem>>
      %85 = arith.mulf %81, %46 : f32
      %86 = arith.mulf %85, %56 : f32
      %87 = arith.subf %84, %86 : f32
      %88 = arith.index_cast %c1_i32_21 : i32 to index
      %c0_22 = arith.constant 0 : index
      %c0_23 = arith.constant 0 : index
      %89 = vector.load %arg8[%88, %c0_22, %c0_23] : memref<2x8x128xf32, #tpu.memory_space<vmem>>, vector<1x8x128xf32>
      %90 = vector.shape_cast %89 : vector<1x8x128xf32> to vector<8x128xf32>
      %91 = vector.broadcast %82 : f32 to vector<8x128xf32>
      %92 = arith.mulf %90, %91 : vector<8x128xf32>
      %93 = arith.addf %4, %92 : vector<8x128xf32>
      %94 = vector.broadcast %87 : f32 to vector<8x128xf32>
      %95 = arith.addf %93, %94 : vector<8x128xf32>
      %96 = arith.index_cast %arg9 : i32 to index
      %97 = arith.index_cast %c1_i32_21 : i32 to index
      %c0_24 = arith.constant 0 : index
      %c0_25 = arith.constant 0 : index
      %98 = vector.load %arg7[%96, %97, %c0_24, %c0_25] : memref<4x2x8x128xf32, #tpu.memory_space<vmem>>, vector<1x1x8x128xf32>
      %99 = vector.shape_cast %98 : vector<1x1x8x128xf32> to vector<8x128xf32>
      %100 = vector.shape_cast %95 : vector<8x128xf32> to vector<1x1x8x128xf32>
      tpu.vector_store %arg7[%96, %97, %c0_24, %c0_25], %100 {strides = array<i32>} : memref<4x2x8x128xf32, #tpu.memory_space<vmem>>, vector<1x1x8x128xf32>,
      %c2_i32_26 = arith.constant 2 : i32
    }
    %c4_i32_0 = arith.constant 4 : i32
    return
  }
  func.func @transform_0(%arg0: i32, %arg1: i32) -> (i32, i32, i32) {
    %c0_i32 = arith.constant 0 : i32
    %c0_i32_0 = arith.constant 0 : i32
    %c0_i32_1 = arith.constant 0 : i32
    return %arg0, %c0_i32, %c0_i32_0 : i32, i32, i32
  }
  func.func @transform_1(%arg0: i32, %arg1: i32) -> i32 {
    %c0_i32 = arith.constant 0 : i32
    %c0_i32_0 = arith.constant 0 : i32
    return %c0_i32 : i32
  }
  func.func @transform_2(%arg0: i32, %arg1: i32) -> i32 {
    %c0_i32 = arith.constant 0 : i32
    %c0_i32_0 = arith.constant 0 : i32
    return %c0_i32 : i32
  }
  func.func @transform_3(%arg0: i32, %arg1: i32) -> i32 {
    %c0_i32 = arith.constant 0 : i32
    %c0_i32_0 = arith.constant 0 : i32
    return %c0_i32 : i32
  }
  func.func @transform_4(%arg0: i32, %arg1: i32) -> i32 {
    %c0_i32 = arith.constant 0 : i32
    %c0_i32_0 = arith.constant 0 : i32
    return %c0_i32 : i32
  }
  func.func @transform_5(%arg0: i32, %arg1: i32) -> (i32, i32, i32, i32) {
    %c0_i32 = arith.constant 0 : i32
    %c0_i32_0 = arith.constant 0 : i32
    %c0_i32_1 = arith.constant 0 : i32
    return %arg0, %arg1, %c0_i32, %c0_i32_0 : i32, i32, i32, i32
  }
}

</mosaic_0001>

<bundles_post_ra>
// kernel: tpu_custom_call.1
= control target key start
LH: loop header
LB: loop body
LE: loop exit
PB: predicated region body
PF: predicated region fallthrough
CT: control target
= control target key end

     0   :  { %s1137_s0 = inlined_call_operand.hbm [shape: f32[4,8,128], index: 0, kind: input, shape index: {}]   ;;  %s1138_s1 = inlined_call_operand.vmem [shape: f32[4], index: 1, kind: input, shape index: {}]   ;;  %s1139_s2 = inlined_call_operand.vmem [shape: f32[4], index: 2, kind: input, shape index: {}]   ;;  %s1140_s3 = inlined_call_operand.vmem [shape: f32[4], index: 3, kind: input, shape index: {}]   ;;  %s1141_s4 = inlined_call_operand.vmem [shape: f32[4], index: 4, kind: input, shape index: {}]   ;;  %s1142_s5 = inlined_call_operand.hbm [shape: f32[4,4,8,128], index: 5, kind: output, shape index: {}]  }
   0x1   :  { %1148 = sst [smem:[#allocation21_spill]] %s1137_s0 }
   0x2   :  { %1149 = sst [smem:[#allocation22_spill]] %s1138_s1 }
   0x3   :  { %1150 = sst [smem:[#allocation23_spill]] %s1139_s2 }
   0x4   :  { %1151 = sst [smem:[#allocation24_spill]] %s1140_s3 }
   0x5   :  { %1152 = sst [smem:[#allocation25_spill]] %s1141_s4 }
   0x6   :  { %10 = vsyncpa [#allocation4], 0 }
   0x7   :  { %11 = vsyncpa [#allocation6], 0 }
   0x8   :  { %12 = vsyncpa [#allocation9], 0 }
   0x9   :  { %13 = vsyncpa [#allocation12], 0 }
   0xa   :  { %14 = vsyncpa [#allocation5], 0 }
   0xb   :  { %16 = vsyncpa [#allocation5 + $0x1], 0  ;;  %s925_s18 = smov 0   ;;  %s927_s19 = smov 0  }
   0xc   :  { %s929_s20 = smov 0   ;;  %s931_s21 = smov 0  }
   0xd   :  { %s933_s22 = smov 0   ;;  %s935_s23 = smov 0  }
   0xe LB: > { %s554_s24 = sadd.s32 4294967295, %s874_s23   ;;  %s555_s25 = sadd.s32 4294967294, %s874_s23   ;;  %s874_s23 = sphi %s935_s23, %s22_s23   ;;  %s870_s22 = sphi %s933_s22, %s1175_s22   ;;  %s866_s21 = sphi %s931_s21, %s1174_s21   ;;  %s862_s20 = sphi %s929_s20, %s1173_s20   ;;  %s858_s19 = sphi %s927_s19, %s1172_s19   ;;  %s854_s18 = sphi %s925_s18, %s1171_s18  }
   0xf   : > { %s31_s26 = sadd.s32 1, %s870_s22  ;;  %s153_s27 = sadd.s32 1, %s862_s20 }
  0x10   : > { %p32_p0 = scmp.ge.s32.totalorder %s31_s26, 2  ;;  %p163_p1 = scmp.ne.s32.totalorder %s862_s20, %s858_s19 }
  0x11   : > { %p164_p2 = scmp.eq.s32.totalorder %s554_s24, 1  ;;  %p169_p3 = scmp.ne.s32.totalorder %s858_s19, %s854_s18 }
  0x12   : > { %s1177_s26 = smov (%p32_p0, %s31_s26), 0  ;;  %p170_p5 = scmp.eq.s32.totalorder %s555_s25, 1 }
  0x13   : > { %p965_p4 = por %p164_p2, %p163_p1  ;;  %s149_s29 = ssub.s32 %s870_s22, %s1177_s26 }
  0x14   : > { %p556_p6 = scmp.ge.s32.totalorder %s874_s23, 1  ;;  %p151_p7 = scmp.eq.s32.totalorder %s149_s29, 0 }
  0x15   : > { %s1153_s28 = scalar_select %p965_p4, 1, 0 }
  0x16   : > { %p972_p8 = por %p170_p5, %p169_p3  ;;  %p177_p9 = scmp.lt.s32.totalorder %s874_s23, 3 }
  0x17   : > { %s978_s6 = scalar_select %p151_p7, %s862_s20, %s153_s27  }
  0x18   : > { %s1154_s30 = scalar_select %p972_p8, 1, 0 }
  0x19   : > { %p980_p10 = pnand %p556_p6, %p177_p9  ;;  %p984_p11 = scmp.eq.s32.totalorder %s554_s24, 0 }
  0x1a   : > { %s1157_s2 = sld [smem:[#allocation23_spill]]  ;;  %s880_s13 = smov [#allocation3]  }
  0x1b   : > { %s1155_s7 = scalar_select %p980_p10, 1, 0 }
  0x1c   : > { %s1156_s8 = scalar_select %p984_p11, 1, 0 }
  0x1d   : > { %p614_p12 = pneg %p980_p10  ;;  %s192_s14 = sshll.u32 %s880_s13, 4  ;;  %s193_s14 = int_to_ptr.vmem [resolvable:$true] %s192_s14 }
  0x1f   : > { %p995_p13 = pnand %p984_p11, %p614_p12 }
  0x20   : > { %s217_s11 = sshll.u32 %s1157_s2, 4  ;;  %s218_s11 = int_to_ptr.vmem [resolvable:$true] %s217_s11 }
  0x21   : > { %s718_s15 = scalar_lea.vmem %s218_s11, 16  ;;  %p1001_p1 = pneg %p995_p13 }
  0x22   : > { %p719_p0 = scmp.ne.s32.totalorder %s218_s11, %s718_s15  ;;  %p726_p5 = scmp.lt.s32.totalorder %s218_s11, %s218_s11 }
  0x23   : > { %p727_p6 = scmp.lt.s32.totalorder %s718_s15, %s718_s15 }
  0x24   : > { %p721_p2 = pnand %p1001_p1, %p719_p0 }
  0x25   : > { %p728_p7 = por %p727_p6, %p726_p5 }
  0x26   : > { %p722_p3 = pneg %p721_p2 }
  0x28   : > { %p729_p9 = pnand %p728_p7, %p722_p3 }
  0x2a   : > { %732 = shalt.err (!%p729_p9)
}
  0x2b   : > { %s881_s17 = smov [#allocation8]   ;;  %s1160_s1 = sld [smem:[#allocation22_spill]] }
  0x2c   : > { %623 = dma.vmem_to_smem (!%p995_p13), %s218_s11, 16, %s881_s17, [#allocation9]  }
  0x2d   : > { %s744_s29 = scalar_lea.vmem %s193_s14, 512  ;;  %p752_p2 = scmp.lt.s32.totalorder %s193_s14, %s193_s14 }
  0x2e   : > { %p745_p12 = scmp.ne.s32.totalorder %s193_s14, %s744_s29  ;;  %p753_p4 = scmp.lt.s32.totalorder %s744_s29, %s744_s29 }
  0x30   : > { %p747_p8 = pnand %p745_p12, %p1001_p1  ;;  %p754_p11 = por %p753_p4, %p752_p2 }
  0x31   : > { %s206_s27 = sshll.u32 %s1160_s1, 4  ;;  %s207_s27 = int_to_ptr.vmem [resolvable:$true] %s206_s27 }
  0x32   : > { %p748_p0 = pneg %p747_p8 }
  0x34   : > { %p755_p5 = pnand %p754_p11, %p748_p0 }
  0x36   : > { %758 = shalt.err (!%p755_p5)
}
  0x37   : > { %s882_s9 = smov 128   ;;  %s883_s10 = smov 8  }
  0x38   : > { %s1161_s0 = sld [smem:[#allocation21_spill]]  ;;  %s759_s15 = scalar_lea.vmem %s207_s27, 16 }
  0x39   : > { %p760_p3 = scmp.ne.s32.totalorder %s207_s27, %s759_s15  ;;  %p767_p7 = scmp.lt.s32.totalorder %s207_s27, %s207_s27 }
  0x3a   : > { %p768_p9 = scmp.lt.s32.totalorder %s759_s15, %s759_s15 }
  0x3b   : > { %p762_p6 = pnand %p760_p3, %p1001_p1 }
  0x3c   : > { %p769_p4 = por %p768_p9, %p767_p7 }
  0x3d   : > { %p763_p8 = pneg %p762_p6 }
  0x3e   : > { %617 = dma.hbm_to_vmem [thread:$0]  (!%p995_p13), %s1161_s0, 512, %s193_s14, [#allocation4], %s882_s9, %s882_s9, %s883_s10  }
  0x3f   : > { %p770_p11 = pnand %p769_p4, %p763_p8 }
  0x41   : > { %773 = shalt.err (!%p770_p11)
}
  0x42   : > { %s884_s17 = smov [#allocation7]   ;;  %s1162_s3 = sld [smem:[#allocation24_spill]] }
  0x43   : > { %620 = dma.vmem_to_smem (!%p995_p13), %s207_s27, 16, %s884_s17, [#allocation6]  }
  0x44   : > { %s1163_s4 = sld [smem:[#allocation25_spill]] }
  0x48   : > { %s228_s14 = sshll.u32 %s1162_s3, 4  ;;  %s229_s14 = int_to_ptr.vmem [resolvable:$true] %s228_s14 }
  0x49   : > { %s774_s11 = scalar_lea.vmem %s229_s14, 16  ;;  %p782_p5 = scmp.lt.s32.totalorder %s229_s14, %s229_s14 }
  0x4a   : > { %s239_s10 = sshll.u32 %s1163_s4, 4  ;;  %p775_p12 = scmp.ne.s32.totalorder %s229_s14, %s774_s11  ;;  %s240_s10 = int_to_ptr.vmem [resolvable:$true] %s239_s10 }
  0x4b   : > { %p783_p3 = scmp.lt.s32.totalorder %s774_s11, %s774_s11 }
  0x4c   : > { %p777_p0 = pnand %p775_p12, %p1001_p1 }
  0x4d   : > { %p784_p6 = por %p783_p3, %p782_p5 }
  0x4e   : > { %p778_p2 = pneg %p777_p0 }
  0x50   : > { %p785_p8 = pnand %p784_p6, %p778_p2 }
  0x52   : > { %788 = shalt.err (!%p785_p8)
}
  0x53   : > { %s885_s27 = smov [#allocation10]   ;;  %s789_s13 = scalar_lea.vmem %s240_s10, 16 }
  0x54   : > { %626 = dma.vmem_to_smem (!%p995_p13), %s229_s14, 16, %s885_s27, [#allocation9]  }
  0x55   : > { %p790_p7 = scmp.ne.s32.totalorder %s240_s10, %s789_s13  ;;  %p797_p11 = scmp.lt.s32.totalorder %s240_s10, %s240_s10 }
  0x56   : > { %p798_p10 = scmp.lt.s32.totalorder %s789_s13, %s789_s13 }
  0x57   : > { %p792_p9 = pnand %p790_p7, %p1001_p1 }
  0x58   : > { %p799_p12 = por %p798_p10, %p797_p11 }
  0x59   : > { %p793_p4 = pneg %p792_p9 }
  0x5b   : > { %p800_p0 = pnand %p799_p12, %p793_p4 }
  0x5d   : > { %803 = shalt.err (!%p800_p0)
}
  0x5e   : > { %s886_s15 = smov [#allocation11]   ;;  %p1164_p2 = scmp.ne.s32.totalorder %s1155_s7, 0 }
  0x5f   : > { %629 = dma.vmem_to_smem (!%p995_p13), %s240_s10, 16, %s886_s15, [#allocation12]  }
  0x60   : > { %252 = sbr.rel (%p1164_p2) target bundleno = 428 (0x1ac), region = 40  ;;  %p1165_p5 = scmp.ne.s32.totalorder (!%p1164_p2), %s1156_s8, 0 }
  0x65   : > { %833 = dma.done.wait (%p1165_p5), [#allocation4], 512  }
  0x66   : > { %835 = vsyncadd (%p1165_p5), [#allocation4], 4294966784 }
  0x67   : > { %837 = dma.done.wait (%p1165_p5), [#allocation6], 16  }
  0x68   : > { %839 = vsyncadd (%p1165_p5), [#allocation6], 4294967280 }
  0x69   : > { %841 = dma.done.wait (%p1165_p5), [#allocation9], 32  }
  0x6a   : > { %843 = vsyncadd (%p1165_p5), [#allocation9], 4294967264 }
  0x6b   : > { %845 = dma.done.wait (%p1165_p5), [#allocation12], 16  }
  0x6c   : > { %847 = vsyncadd (%p1165_p5), [#allocation12], 4294967280 }
  0x6d   : > { %274 = sfence }
  0x6e   : > { %s1147_s7 = sand.u32 1, %s858_s19   ;;  %s1057_s12 = sshll.u32 %s866_s21, 1 }
  0x6f   : > { %s1061_s16 = sshll.u32 %s1147_s7, 6  ;;  %s1064_s24 = smov 0  }
  0x70 LB: >> { %s305_s8 = sld [smem:[#allocation7 + %s1057_s12]]  ;;  %s570_s14 = sshll.u32 %s878_s24, 3  ;;  %s878_s24 = sphi %s1064_s24, %s301_s24  }
  0x71   : >> { %s308_s25 = sld [smem:[#allocation8 + %s1057_s12]]  ;;  %s1073_s29 = sadd.s32 1, %s1057_s12 }
  0x72   : >> { %s317_s9 = sld [smem:[#allocation7 + %s1073_s29]]  ;;  %s303_s10 = scalar_lea.vmem [#allocation3], %s570_s14 }
  0x73   : >> { %v1076_v0 = vld [vmem:[%s303_s10] sm:$0xff]  ;;  %s320_s11 = sld [smem:[#allocation8 + %s1073_s29]] }
  0x74   : >> { %s356_s7 = sld [smem:[#allocation10 + %s1057_s12]] }
  0x75   : >> { %s371_s17 = sld [smem:[#allocation10 + %s1073_s29]] }
  0x76   : >> { %v306_v1 = vstv %s305_s8  ;;  %s358_s0 = sld [smem:[#allocation11 + %s1057_s12]] }
  0x77   : >> { %v307_v2 = vmul.f32 %v306_v1, %v1076_v0  ;;  %v309_v3 = vstv %s308_s25  ;;  %s373_s1 = sld [smem:[#allocation11 + %s1073_s29]] }
  0x78   : >> { %v318_v5 = vstv %s317_s9  ;;  %s887_s9 = smov 0.0  }
  0x79   : >> { %v310_v4 = vadd.f32 %v309_v3, %v307_v2  ;;  %v319_v6 = vmul.f32 %v318_v5, %v1076_v0  ;;  %v321_v7 = vstv %s320_s11 }
  0x7b   : >> { %v311_v8 = vmax.f32 %v310_v4, 0.0  ;;  %v322_v9 = vadd.f32 %v321_v7, %v319_v6 }
  0x7d   : >> { %v323_v10 = vmax.f32 %v322_v9, 0.0  ;;  %v314_v11 = vmul.f32 %v311_v8, %v311_v8 }
  0x7f   : >> { %v326_v12 = vadd.f32 %v323_v10, %v311_v8  ;;  %v327_v13 = vmul.f32 %v323_v10, %v323_v10 }
  0x81   : >> { %329 = vadd.xlane.f32.xlu0 %v326_v12  ;;  %v328_v14 = vadd.f32 %v327_v13, %v314_v11 }
  0x85   : >> { %339 = vadd.xlane.f32.xlu0 %v328_v14 }
 0x10a   : >> { %v330_v15 = vpop.xlane.xlu0 %329 }
 0x10b   : >> { %v331_v16 = vrot.slane %v330_v15, 4 }
 0x10d   : >> { %v332_v17 = vadd.f32 %v331_v16, %v330_v15 }
 0x10e   : >> { %v340_v18 = vpop.xlane.xlu0 %339 }
 0x10f   : >> { %v333_v19 = vrot.slane %v332_v17, 2  ;;  %v341_v20 = vrot.slane %v340_v18, 4 }
 0x111   : >> { %v342_v21 = vadd.f32 %v341_v20, %v340_v18  ;;  %v334_v22 = vadd.f32 %v333_v19, %v332_v17 }
 0x113   : >> { %v343_v23 = vrot.slane %v342_v21, 2  ;;  %v335_v24 = vrot.slane %v334_v22, 1 }
 0x115   : >> { %v344_v25 = vadd.f32 %v343_v23, %v342_v21  ;;  %v336_v26 = vadd.f32 %v335_v24, %v334_v22 }
 0x117   : >> { %580 = vpush %v336_v26  ;;  %v345_v27 = vrot.slane %v344_v25, 1 }
 0x119   : >> { %v346_v28 = vadd.f32 %v345_v27, %v344_v25 }
 0x11b   : >> { %582 = vpush %v346_v28 }
 0x148   : >> { %s581_s27 = spop %580 }
 0x149   : >> { %s338_s13 = smul.f32 0.00048828125, %s581_s27 }
 0x14b   : >> { %s349_s25 = smul.f32 %s338_s13, %s338_s13 }
 0x14c   : >> { %s583_s15 = spop %582  ;;  %s359_s2 = smul.f32 %s356_s7, %s338_s13 }
 0x14d   : >> { %s348_s8 = smul.f32 0.00048828125, %s583_s15 }
 0x14e   : >> { %s374_s3 = smul.f32 %s371_s17, %s338_s13 }
 0x14f   : >> { %s350_s14 = ssub.f32 %s348_s8, %s349_s25  ;;  %s571_s8 = sshll.u32 %s878_s24, 4 }
 0x150   : >> { %s301_s24 = sadd.s32 1, %s878_s24  }
 0x151   : >> { %s351_s10 = smax.f32 %s887_s9, %s350_s14  ;;  %p298_p10 = scmp.ge.s32.totalorder %s301_s24, 4  }
 0x152   : >> { %s352_s11 = sadd.f32 1e-05, %s351_s10 }
 0x154   : >> { %v353_v29 = vstv %s352_s11  ;;  %s1166_s11 = scalar_lea.vmem [#allocation13], %s1061_s16 }
 0x155   : >> { %716 = vrsqrt.f32 %v353_v29  ;;  %s369_s29 = scalar_lea.vmem %s1166_s11, %s571_s8 [#allocation13] }
 0x162   : >> { %v717_v30 = vpop.eup %716 }
 0x163   : >> { %584 = vpush %v717_v30 }
 0x194   : >> { %s585_s27 = spop %584 }
 0x195   : >> { %s357_s4 = smul.f32 %s585_s27, %s356_s7 }
 0x196   : >> { %s360_s15 = smul.f32 %s585_s27, %s359_s2 }
 0x197   : >> { %v363_v31 = vstv %s357_s4  ;;  %s372_s25 = smul.f32 %s585_s27, %s371_s17 }
 0x198   : >> { %s361_s14 = ssub.f32 %s358_s0, %s360_s15  ;;  %v364_v32 = vmul.f32 %v363_v31, %v311_v8  ;;  %s375_s9 = smul.f32 %s585_s27, %s374_s3 }
 0x199   : >> { %v378_v33 = vstv %s372_s25  ;;  %s1167_s0 = sand.u32 (%p298_p10), 1, %s858_s19  }
 0x19a   : >> { %v365_v34 = vadd.f32 %v364_v32, %v1076_v0  ;;  %s376_s10 = ssub.f32 %s373_s1, %s375_s9  ;;  %v379_v35 = vmul.f32 %v378_v33, %v323_v10  ;;  %v366_v36 = vstv %s361_s14  ;;  %s387_s1 = scalar_lea.sflag (%p298_p10), [#allocation5], %s1167_s0 }
 0x19c   : >> { %v367_v37 = vadd.f32 %v366_v36, %v365_v34  ;;  %v380_v38 = vadd.f32 %v379_v35, %v1076_v0  ;;  %v381_v39 = vstv %s376_s10  ;;  %300 = sbr.rel (!%p298_p10) target bundleno = 112 (0x70), region = 111 }
 0x19e   : >> { %370 = vst [vmem:[%s369_s29] sm:$0xff] %v367_v37  ;;  %v382_v40 = vadd.f32 %v381_v39, %v380_v38 }
 0x1a0   : >> { %573 = vst [vmem:[%s369_s29 + $0x8] sm:$0xff] %v382_v40 }
 0x1a1   : > { %s579_s2 = sshll.u32 %s866_s21, 8  ;;  %s1168_s3 = scalar_lea.vmem [#allocation13], %s1061_s16 }
 0x1a2   : > { %s413_s4 = sshll.u32 %s1168_s3, 4  ;;  %s402_s24 = scalar_lea.hbm %s1142_s5, %s579_s2  ;;  %s414_s4 = int_to_ptr.vmem [resolvable:$true] %s413_s4 }
 0x1a3   : > { %s888_s12 = smov 256   ;;  %p1169_p13 = scmp.ne.s32.totalorder %s1153_s28, 0 }
 0x1a4   : > { %s889_s13 = smov 512   ;;  %s890_s27 = smov 2  }
 0x1a5   : > { %606 = sst [smem:[#allocation15]] (%p1169_p13), %s888_s12  ;;  %s891_s15 = smov 128  }
 0x1a6   : > { %607 = sst [smem:[#allocation15 + $0x1]] (%p1169_p13), %s889_s13  ;;  %s892_s21 = smov 8  }
 0x1a7   : > { %608 = sst [smem:[#allocation15 + $0x2]] (%p1169_p13), %s890_s27  ;;  %s893_s16 = smov 131072  }
 0x1a8   : > { %609 = sst [smem:[#allocation15 + $0x3]] (%p1169_p13), %s891_s15  ;;  %s894_s8 = smov 0  }
 0x1a9   : > { %610 = sst [smem:[#allocation15 + $0x4]] (%p1169_p13), %s891_s15 }
 0x1aa   : > { %611 = sst [smem:[#allocation15 + $0x5]] (%p1169_p13), %s892_s21 }
 0x1ab   : > { %612 = dma.general (%p1169_p13), %s414_s4, 1024, %s402_s24, %s387_s1, %s893_s16, [#allocation15], %s894_s8, 0  }
 0x1ac PF: > { %p644_p1 = scmp.ge.s32.totalorder %s874_s23, 2  ;;  %s441_s25 = sand.u32 1, %s854_s18  }
 0x1ad   : > { %p1170_p3 = scmp.ne.s32.totalorder %s1154_s30, 0  ;;  %s442_s14 = scalar_lea.sflag [#allocation5], %s441_s25 }
 0x1af   : > { %p631_p6 = pnand %p644_p1, %p1170_p3 }
 0x1b1   : > { %p632_p8 = pneg %p631_p6 }
 0x1b3   : > { %849 = dma.done.wait (%p632_p8), %s442_s14, 1024  }
 0x1b4   : > { %851 = vsyncadd (%p632_p8), %s442_s14, 4294966272  ;;  %s22_s23 = sadd.s32 1, %s874_s23   ;;  %s1171_s18 = smov %s858_s19 }
 0x1b5   : > { %p19_p7 = scmp.ge.s32.totalorder %s22_s23, 4   ;;  %s1172_s19 = smov %s862_s20 }
 0x1b6   : > { %s1173_s20 = smov %s978_s6  ;;  %s1174_s21 = smov %s870_s22 }
 0x1b7   : > { %s1175_s22 = smov %s1177_s26  ;;  %21 = sbr.rel (!%p19_p7) target bundleno = 14 (0xe), region = 122 }
 0x1bc   :  { %447 = vsyncpa [#allocation4], 1 }
 0x1bd   :  { %449 = vsyncpa [#allocation4 + $0x1], 1 }
 0x1be   :  { %450 = vsyncpa [#allocation5], 1 }
 0x1bf   :  { %452 = vsyncpa [#allocation5 + $0x1], 1 }
 0x1c0   :  { %453 = vsyncpa [#allocation6], 1 }
 0x1c1   :  { %455 = vsyncpa [#allocation6 + $0x1], 1 }
 0x1c2   :  { %456 = vsyncpa [#allocation9], 1 }
 0x1c3   :  { %457 = vsyncpa [#allocation12], 1 }

</bundles_post_ra>
